<compile_context>
chip_gen: v6e
topology: v6e:2x2x1
jax: 0.10.0
libtpu: 0.0.40
codegen_flags: <defaults>
</compile_context>

<pallas_src>
import functools

import numpy as np

import jax
import jax.numpy as jnp
from jax.experimental import pallas as pl
from jax.experimental.pallas import tpu as pltpu

_LANES = 128
_MIB = 1024 * 1024


# --------------------------------------------------------------------------- #
# Generation-aware sizing
# --------------------------------------------------------------------------- #
def _gen_params():
    """Per-generation (f32-equivalent) block target and VMEM limit cap."""
    kind = ""
    try:
        kind = jax.devices()[0].device_kind.lower()
    except Exception:  # pragma: no cover - defensive
        pass
    if "v7" in kind or "7x" in kind:
        # 64 MiB physical VMEM -> keep headroom; 3.2 TB/s -> want big blocks.
        return {"block_target": 6 * _MIB, "vmem_cap": 56 * _MIB}
    if "v6" in kind:
        return {"block_target": 4 * _MIB, "vmem_cap": 96 * _MIB}
    if "v5" in kind:
        return {"block_target": 2 * _MIB, "vmem_cap": 96 * _MIB}
    return {"block_target": 2 * _MIB, "vmem_cap": 56 * _MIB}  # unknown: conservative


def _pick_tiles(b, rows_m, lanes, target_bytes):
    """Pick (tile_b, tile_m). Budget counts f32 working-set bytes per input."""
    row_bytes = lanes * 4
    max_rows = max(8, target_bytes // row_bytes)   # total (tile_b * tile_m) rows/block

    if rows_m <= max_rows:
        tile_m = rows_m                            # full plane per block (legal full-dim)
        tb_budget = max(1, max_rows // max(rows_m, 1))
        tile_b = 1
        for d in range(1, b + 1):                  # largest divisor of b within budget
            if b % d == 0 and d <= tb_budget:
                tile_b = d
        return tile_b, tile_m

    # Plane larger than the block target: tile within the plane.
    # Prefer an exact divisor of rows_m (multiple of 8) -> no ragged tail.
    best_div = 0
    for d in range(int(max_rows), 7, -1):
        if d % 8 == 0 and rows_m % d == 0:
            best_div = d
            break
    if best_div >= max(8, max_rows // 2):
        tile_m = best_div
    else:
        tile_m = max(8, (int(max_rows) // 8) * 8)  # ragged tail masked in-kernel
    return 1, tile_m


# --------------------------------------------------------------------------- #
# Kernel
# --------------------------------------------------------------------------- #
def _boundary_sum_kernel(cls_ref, bblk_ref, mbase_ref,   # scalar-prefetch (SMEM)
                         p_ref, s_ref, out_ref, *,
                         rows_m, tile_m, n_tiles_m, acc_rows, lanes):
    """Accumulate sum(probs_block * sdf_block) into the resident output row.

    Grid = (parts, reduction steps).  Axis 0 is parallel (each part owns its
    own output row), axis 1 is the sequential reduction over m-tiles.
    """
    pid = pl.program_id(0)
    mi = pl.program_id(1)

    @pl.when(mi == 0)
    def _init():
        out_ref[...] = jnp.zeros_like(out_ref)

    # Native-dtype DMA; upcast to f32 on the VPU after load.
    prod = p_ref[...].astype(jnp.float32) * s_ref[...].astype(jnp.float32)

    def _accum(x):
        if acc_rows == 8:
            # VALU-only: fold (tile_b, 1, tile_m, L) into groups of 8 sublanes,
            # add vregs; the final 8->1 reduce happens once in the wrapper.
            red = jnp.sum(x.reshape(-1, acc_rows, lanes), axis=0)
        else:
            red = jnp.sum(x, axis=(0, 1, 2)).reshape(1, lanes)
        out_ref[0, 0] += red

    if rows_m % tile_m == 0:
        _accum(prod)                               # no ragged tail -> no mask at all
    else:
        gtile = mbase_ref[pid] + mi                # global m-tile index

        @pl.when(gtile != n_tiles_m - 1)
        def _full():
            _accum(prod)

        @pl.when(gtile == n_tiles_m - 1)           # mask only the single ragged tile
        def _ragged():
            r = gtile * tile_m + jax.lax.broadcasted_iota(jnp.int32, prod.shape, 2)
            _accum(jnp.where(r < rows_m, prod, 0.0))


@functools.partial(
    jax.jit,
    static_argnames=("tile_b", "tile_m", "acc_rows", "grid_steps",
                     "n_tiles_m", "rows_m", "n_elems", "vmem_limit"))
def _boundary_mean(probs4, sdf4, cls_tbl, bblk_tbl, mbase_tbl, *,
                   tile_b, tile_m, acc_rows, grid_steps,
                   n_tiles_m, rows_m, n_elems, vmem_limit):
    """probs4/sdf4: (B, C, rows_m, lanes) native dtype; tables: (P,) int32."""
    n_parts = cls_tbl.shape[0]
    lanes = probs4.shape[-1]

    kernel = functools.partial(
        _boundary_sum_kernel,
        rows_m=rows_m, tile_m=tile_m, n_tiles_m=n_tiles_m,
        acc_rows=acc_rows, lanes=lanes)

    def in_map(p, mi, cls, bblk, mbase):
        # (batch block, class element, m block, lane block)
        return (bblk[p], cls[p], mbase[p] + mi, 0)

    def out_map(p, mi, cls, bblk, mbase):
        return (p, 0, 0, 0)                        # invariant along mi -> accumulator

    bytes_in = n_elems * (probs4.dtype.itemsize + sdf4.dtype.itemsize)
    cost = pl.CostEstimate(
        flops=2 * n_elems,
        transcendentals=0,
        bytes_accessed=bytes_in + n_parts * acc_rows * lanes * 4)

    partials = pl.pallas_call(
        kernel,
        out_shape=jax.ShapeDtypeStruct((n_parts, 1, acc_rows, lanes), jnp.float32),
        grid_spec=pltpu.PrefetchScalarGridSpec(
            num_scalar_prefetch=3,
            grid=(n_parts, grid_steps),
            in_specs=[
                pl.BlockSpec((tile_b, 1, tile_m, lanes), in_map),
                pl.BlockSpec((tile_b, 1, tile_m, lanes), in_map),
            ],
            out_specs=pl.BlockSpec((1, 1, acc_rows, lanes), out_map),
        ),
        compiler_params=pltpu.CompilerParams(
            dimension_semantics=("parallel", "arbitrary"),
            vmem_limit_bytes=vmem_limit),
        cost_estimate=cost,
    )(cls_tbl, bblk_tbl, mbase_tbl, probs4, sdf4)

    # Single tiny cross-lane/sublane reduction over the (P, 1, acc_rows, lanes)
    # partial sums, then scale to the mean.
    return jnp.sum(partials) * jnp.float32(1.0 / n_elems)


# --------------------------------------------------------------------------- #
# Public wrapper (matches BoundaryLoss.forward semantics)
# --------------------------------------------------------------------------- #
def boundary_loss(probs, sdf, idc, *, validate=False):
    """JAX/Pallas equivalent of BoundaryLoss(idc).forward(probs, sdf).

    probs, sdf: (B, C, H, W).  Returns a float32 scalar.
    validate=True reproduces the torch sum-to-1 check (host-blocking, eager only).
    """
    if probs.shape != sdf.shape:
        raise ValueError("probs and sdf must have the same shape")
    if probs.ndim != 4:
        raise ValueError("expected (B, C, H, W) inputs")
    b, c, h, w = probs.shape

    idc_np = np.asarray(idc, dtype=np.int32).reshape(-1)
    if idc_np.size == 0:
        raise ValueError("idc must be non-empty")
    if np.any(idc_np < 0) or np.any(idc_np >= c):
        raise ValueError("idc indices out of range")
    k = int(idc_np.size)

    if validate:
        # TODO(synk): host-blocking check like the torch module; eager-mode only.
        s1 = probs.sum(axis=1)
        if not bool(jnp.allclose(s1, jnp.ones_like(s1), atol=1e-4)):
            raise ValueError("`probs` must sum to 1 over classes")

    # Lane-dense plane view (free contiguous reshape) when H*W divides 128.
    if (h * w) % _LANES == 0:
        rows_m, lanes = (h * w) // _LANES, _LANES
    else:
        rows_m, lanes = h, w                       # fallback: masked lanes, still correct
    probs4 = probs.reshape(b, c, rows_m, lanes)
    sdf4 = sdf.reshape(b, c, rows_m, lanes)

    params = _gen_params()
    tile_b, tile_m = _pick_tiles(b, rows_m, lanes, params["block_target"])
    acc_rows = 8 if (tile_m % 8 == 0 and lanes % _LANES == 0) else 1

    n_tiles_m = -(-rows_m // tile_m)
    n_bt = b // tile_b                             # tile_b always divides b

    # Megacore: if only one (class, batch-tile) unit of parallel work exists,
    # split the reduction range in two so v7x's second TensorCore isn't idle.
    n_splits = 2 if (k * n_bt == 1 and n_tiles_m >= 2 and n_tiles_m % 2 == 0) else 1
    grid_steps = n_tiles_m // n_splits

    cls_l, bblk_l, mbase_l = [], [], []
    for kk in range(k):
        for bt in range(n_bt):
            for s in range(n_splits):
                cls_l.append(int(idc_np[kk]))
                bblk_l.append(bt)
                mbase_l.append(s * grid_steps)
    cls_tbl = jnp.asarray(np.asarray(cls_l, dtype=np.int32))
    bblk_tbl = jnp.asarray(np.asarray(bblk_l, dtype=np.int32))
    mbase_tbl = jnp.asarray(np.asarray(mbase_l, dtype=np.int32))

    # VMEM budget: double-buffered native input blocks + f32 temporaries + slack.
    native_block = tile_b * tile_m * lanes * (probs.dtype.itemsize + sdf.dtype.itemsize)
    f32_block = tile_b * tile_m * lanes * 4
    vmem_limit = int(min(params["vmem_cap"],
                         max(32 * _MIB, 2 * native_block + 4 * f32_block + 4 * _MIB)))

    n_elems = b * k * h * w
    return _boundary_mean(
        probs4, sdf4, cls_tbl, bblk_tbl, mbase_tbl,
        tile_b=tile_b, tile_m=tile_m, acc_rows=acc_rows, grid_steps=grid_steps,
        n_tiles_m=n_tiles_m, rows_m=rows_m, n_elems=n_elems, vmem_limit=vmem_limit)


# --------------------------------------------------------------------------- #
# Demo / self-test
# --------------------------------------------------------------------------- #
if __name__ == "__main__":
    key = jax.random.PRNGKey(0)
    k1, k2, k3, k4 = jax.random.split(key, 4)

    # 1) Small case matching the module's typical use: (B, C, H, W) = (2, 4, 16, 16).
    B, C, H, W = 2, 4, 16, 16
    idc = [1, 2]
    logits = jax.random.normal(k1, (B, C, H, W), dtype=jnp.float32)
    probs = jax.nn.softmax(logits, axis=1)          # sums to 1 over classes
    sdf = jax.random.normal(k2, (B, C, H, W), dtype=jnp.float32)

    loss = boundary_loss(probs, sdf, idc, validate=True)
    jax.block_until_ready(loss)

    idc_arr = jnp.asarray(idc)
    ref = (probs[:, idc_arr] * sdf[:, idc_arr]).mean()
    assert jnp.allclose(loss, ref, atol=1e-6, rtol=1e-6), (loss, ref)

    # 2) Native bf16 inputs (f32 accumulation in-kernel).
    probs_bf = probs.astype(jnp.bfloat16)
    sdf_bf = sdf.astype(jnp.bfloat16)
    loss_bf = boundary_loss(probs_bf, sdf_bf, idc)
    jax.block_until_ready(loss_bf)
    ref_bf = (probs_bf.astype(jnp.float32)[:, idc_arr]
              * sdf_bf.astype(jnp.float32)[:, idc_arr]).mean()
    assert jnp.allclose(loss_bf, ref_bf, atol=1e-5, rtol=1e-5), (loss_bf, ref_bf)

    # 3) Bigger planes + non-contiguous idc: exercises the 8-row VALU accumulator
    #    and batch grouping (tile_b > 1).
    B2, C2, H2, W2 = 2, 3, 64, 64
    idc2 = [0, 2]
    logits2 = jax.random.normal(k3, (B2, C2, H2, W2), dtype=jnp.float32)
    probs2 = jax.nn.softmax(logits2, axis=1)
    sdf2 = jax.random.normal(k4, (B2, C2, H2, W2), dtype=jnp.float32)
    loss2 = boundary_loss(probs2, sdf2, idc2)
    jax.block_until_ready(loss2)
    idc2_arr = jnp.asarray(idc2)
    ref2 = (probs2[:, idc2_arr] * sdf2[:, idc2_arr]).mean()
    assert jnp.allclose(loss2, ref2, atol=1e-6, rtol=1e-5), (loss2, ref2)

    print("KERNEL_OK")
</pallas_src>

<mosaic_0001>
module attributes {stable_mosaic.version = 11 : i64} {
  func.func @_boundary_sum_kernel(%arg0: i32, %arg1: i32, %arg2: memref<2xi32, #tpu.memory_space<smem>>, %arg3: memref<2xi32, #tpu.memory_space<smem>>, %arg4: memref<2xi32, #tpu.memory_space<smem>>, %arg5: memref<2x1x2x128xf32, #tpu.memory_space<vmem>>, %arg6: memref<2x1x2x128xf32, #tpu.memory_space<vmem>>, %arg7: memref<1x1x1x128xf32, #tpu.memory_space<vmem>>) attributes {dimension_semantics = [#tpu.dimension_semantics<parallel>, #tpu.dimension_semantics<arbitrary>], iteration_bounds = array<i64: 2, 1>, scalar_prefetch = 3 : i64, scratch_operands = 0 : i64, tpu.core_type = #tpu.core_type<tc>, window_params = [{transform_indices = @transform_0, window_bounds = array<i64: 2, 1, 2, 128>}, {transform_indices = @transform_1, window_bounds = array<i64: 2, 1, 2, 128>}, {transform_indices = @transform_2, window_bounds = array<i64: 1, 1, 1, 128>}]} {
    %c0_i32 = arith.constant 0 : i32
    %0 = arith.cmpi eq, %arg1, %c0_i32 : i32
    %1 = arith.extui %0 : i1 to i32
    %c0_i32_0 = arith.constant 0 : i32
    %2 = arith.cmpi ne, %1, %c0_i32_0 : i32
    scf.if %2 {
      %cst_16 = arith.constant 0.000000e+00 : f32
      %14 = vector.broadcast %cst_16 : f32 to vector<1x1x1x128xf32>
      %c0_17 = arith.constant 0 : index
      %c0_18 = arith.constant 0 : index
      %c0_19 = arith.constant 0 : index
      %c0_20 = arith.constant 0 : index
      %15 = vector.load %arg7[%c0_17, %c0_18, %c0_19, %c0_20] : memref<1x1x1x128xf32, #tpu.memory_space<vmem>>, vector<1x1x1x128xf32>
      tpu.vector_store %arg7[%c0_17, %c0_18, %c0_19, %c0_20], %14 {strides = array<i32>} : memref<1x1x1x128xf32, #tpu.memory_space<vmem>>, vector<1x1x1x128xf32>,
    } else {
    }
    %c0 = arith.constant 0 : index
    %c0_1 = arith.constant 0 : index
    %c0_2 = arith.constant 0 : index
    %c0_3 = arith.constant 0 : index
    %3 = vector.load %arg5[%c0, %c0_1, %c0_2, %c0_3] : memref<2x1x2x128xf32, #tpu.memory_space<vmem>>, vector<2x1x2x128xf32>
    %c0_4 = arith.constant 0 : index
    %c0_5 = arith.constant 0 : index
    %c0_6 = arith.constant 0 : index
    %c0_7 = arith.constant 0 : index
    %4 = vector.load %arg6[%c0_4, %c0_5, %c0_6, %c0_7] : memref<2x1x2x128xf32, #tpu.memory_space<vmem>>, vector<2x1x2x128xf32>
    %5 = arith.mulf %3, %4 : vector<2x1x2x128xf32>
    %cst = arith.constant dense<0.000000e+00> : vector<128xf32>
    %6 = vector.multi_reduction <add>, %5, %cst [0, 1, 2] : vector<2x1x2x128xf32> to vector<128xf32>
    %7 = vector.shape_cast %6 : vector<128xf32> to vector<1x128xf32>
    %c0_8 = arith.constant 0 : index
    %c0_9 = arith.constant 0 : index
    %c0_10 = arith.constant 0 : index
    %c0_11 = arith.constant 0 : index
    %8 = vector.load %arg7[%c0_8, %c0_9, %c0_10, %c0_11] : memref<1x1x1x128xf32, #tpu.memory_space<vmem>>, vector<1x1x1x128xf32>
    %9 = vector.shape_cast %8 : vector<1x1x1x128xf32> to vector<1x128xf32>
    %10 = arith.addf %9, %7 : vector<1x128xf32>
    %c0_12 = arith.constant 0 : index
    %c0_13 = arith.constant 0 : index
    %c0_14 = arith.constant 0 : index
    %c0_15 = arith.constant 0 : index
    %11 = vector.load %arg7[%c0_12, %c0_13, %c0_14, %c0_15] : memref<1x1x1x128xf32, #tpu.memory_space<vmem>>, vector<1x1x1x128xf32>
    %12 = vector.shape_cast %11 : vector<1x1x1x128xf32> to vector<1x128xf32>
    %13 = vector.shape_cast %10 : vector<1x128xf32> to vector<1x1x1x128xf32>
    tpu.vector_store %arg7[%c0_12, %c0_13, %c0_14, %c0_15], %13 {strides = array<i32>} : memref<1x1x1x128xf32, #tpu.memory_space<vmem>>, vector<1x1x1x128xf32>,
    return
  }
  func.func @transform_0(%arg0: i32, %arg1: i32, %arg2: memref<2xi32, #tpu.memory_space<smem>>, %arg3: memref<2xi32, #tpu.memory_space<smem>>, %arg4: memref<2xi32, #tpu.memory_space<smem>>) -> (i32, i32, i32, i32) {
    %0 = arith.index_cast %arg0 : i32 to index
    %1 = memref.load %arg3[%0] : memref<2xi32, #tpu.memory_space<smem>>
    %2 = arith.index_cast %arg0 : i32 to index
    %3 = memref.load %arg2[%2] : memref<2xi32, #tpu.memory_space<smem>>
    %4 = arith.index_cast %arg0 : i32 to index
    %5 = memref.load %arg4[%4] : memref<2xi32, #tpu.memory_space<smem>>
    %6 = arith.addi %5, %arg1 : i32
    %c0_i32 = arith.constant 0 : i32
    %c0_i32_0 = arith.constant 0 : i32
    return %1, %3, %6, %c0_i32 : i32, i32, i32, i32
  }
  func.func @transform_1(%arg0: i32, %arg1: i32, %arg2: memref<2xi32, #tpu.memory_space<smem>>, %arg3: memref<2xi32, #tpu.memory_space<smem>>, %arg4: memref<2xi32, #tpu.memory_space<smem>>) -> (i32, i32, i32, i32) {
    %0 = arith.index_cast %arg0 : i32 to index
    %1 = memref.load %arg3[%0] : memref<2xi32, #tpu.memory_space<smem>>
    %2 = arith.index_cast %arg0 : i32 to index
    %3 = memref.load %arg2[%2] : memref<2xi32, #tpu.memory_space<smem>>
    %4 = arith.index_cast %arg0 : i32 to index
    %5 = memref.load %arg4[%4] : memref<2xi32, #tpu.memory_space<smem>>
    %6 = arith.addi %5, %arg1 : i32
    %c0_i32 = arith.constant 0 : i32
    %c0_i32_0 = arith.constant 0 : i32
    return %1, %3, %6, %c0_i32 : i32, i32, i32, i32
  }
  func.func @transform_2(%arg0: i32, %arg1: i32, %arg2: memref<2xi32, #tpu.memory_space<smem>>, %arg3: memref<2xi32, #tpu.memory_space<smem>>, %arg4: memref<2xi32, #tpu.memory_space<smem>>) -> (i32, i32, i32, i32) {
    %c0_i32 = arith.constant 0 : i32
    %c0_i32_0 = arith.constant 0 : i32
    %c0_i32_1 = arith.constant 0 : i32
    %c0_i32_2 = arith.constant 0 : i32
    return %arg0, %c0_i32, %c0_i32_0, %c0_i32_1 : i32, i32, i32, i32
  }
}

</mosaic_0001>

<bundles_post_ra>
// kernel: _boundary_mean.1
= control target key start
LH: loop header
LB: loop body
LE: loop exit
PB: predicated region body
PF: predicated region fallthrough
CT: control target
= control target key end

     0   :  { %s1039_s0 = inlined_call_operand.vmem [shape: s32[2], index: 0, kind: input, shape index: {}]   ;;  %s1040_s3 = inlined_call_operand.hbm [shape: f32[2,4,2,128], index: 3, kind: input, shape index: {}]   ;;  %s1041_s4 = inlined_call_operand.hbm [shape: f32[2,4,2,128], index: 4, kind: input, shape index: {}]   ;;  %s1042_s5 = inlined_call_operand.vmem [shape: f32[2,1,1,128], index: 5, kind: output, shape index: {}]   ;;  %s1043_s1 = inlined_call_operand.vmem [shape: s32[2], index: 1, kind: input, shape index: {}]   ;;  %s1044_s2 = inlined_call_operand.vmem [shape: s32[2], index: 2, kind: input, shape index: {}]  }
   0x1   :  { %1056 = sst [smem:[#allocation28_spill]] %s1040_s3  ;;  %s10_s20 = sshll.u32 %s1039_s0, 4  ;;  %s11_s20 = int_to_ptr.vmem [resolvable:$true] %s10_s20 }
   0x2   :  { %s14_s23 = sshll.u32 %s1043_s1, 4  ;;  %s533_s24 = scalar_lea.vmem %s11_s20, 16  ;;  %s15_s23 = int_to_ptr.vmem [resolvable:$true] %s14_s23 }
   0x3   :  { %p534_p0 = scmp.ne.s32.totalorder %s11_s20, %s533_s24  ;;  %p538_p1 = scmp.lt.s32.totalorder %s11_s20, %s11_s20 }
   0x4   :  { %p539_p2 = scmp.lt.s32.totalorder %s533_s24, %s533_s24 }
   0x6   :  { %p540_p3 = por %p539_p2, %p538_p1 }
   0x8   :  { %p541_p4 = pnand %p540_p3, %p534_p0 }
   0xa   :  { %544 = shalt.err (!%p541_p4)  }
   0xb   :  { %s707_s25 = smov [#allocation3]   ;;  %s545_s26 = scalar_lea.vmem %s15_s23, 16 }
   0xc   :  { %13 = dma.vmem_to_smem %s11_s20, 16, %s707_s25, [#allocation2] }
   0xd   :  { %p546_p5 = scmp.ne.s32.totalorder %s15_s23, %s545_s26  ;;  %p550_p6 = scmp.lt.s32.totalorder %s15_s23, %s15_s23 }
   0xe   :  { %p551_p7 = scmp.lt.s32.totalorder %s545_s26, %s545_s26 }
  0x10   :  { %p552_p8 = por %p551_p7, %p550_p6 }
  0x12   :  { %p553_p9 = pnand %p552_p8, %p546_p5 }
  0x14   :  { %556 = shalt.err (!%p553_p9)  }
  0x15   :  { %s708_s0 = smov [#allocation4]   ;;  %s18_s28 = sshll.u32 %s1044_s2, 4  ;;  %s19_s28 = int_to_ptr.vmem [resolvable:$true] %s18_s28 }
  0x16   :  { %17 = dma.vmem_to_smem %s15_s23, 16, %s708_s0, [#allocation2] }
  0x17   :  { %s557_s29 = scalar_lea.vmem %s19_s28, 16  ;;  %p562_p11 = scmp.lt.s32.totalorder %s19_s28, %s19_s28 }
  0x18   :  { %p558_p10 = scmp.ne.s32.totalorder %s19_s28, %s557_s29  ;;  %p563_p12 = scmp.lt.s32.totalorder %s557_s29, %s557_s29 }
  0x1a   :  { %p564_p13 = por %p563_p12, %p562_p11 }
  0x1c   :  { %p565_p0 = pnand %p564_p13, %p558_p10 }
  0x1e   :  { %568 = shalt.err (!%p565_p0)  }
  0x1f   :  { %s709_s30 = smov [#allocation5]  }
  0x20   :  { %21 = dma.vmem_to_smem %s19_s28, 16, %s709_s30, [#allocation2] }
  0x21   :  { %661 = dma.done.wait [#allocation2], 48 }
  0x22   :  { %662 = vsyncadd [#allocation2], 4294967248 }
  0x23   :  { %23 = sfence }
  0x24   :  { %24 = vsyncpa [#allocation7], 0 }
  0x25   :  { %26 = vsyncpa [#allocation7 + $0x1], 0 }
  0x26   :  { %27 = vsyncpa [#allocation9], 0 }
  0x27   :  { %29 = vsyncpa [#allocation9 + $0x1], 0  ;;  %s755_s6 = smov 0   ;;  %s757_s2 = smov 0  }
  0x28   :  { %s759_s7 = smov 0   ;;  %s761_s8 = smov 0  }
  0x29   :  { %s763_s9 = smov 0   ;;  %s765_s10 = smov 0  }
  0x2a   :  { %s767_s11 = smov 0   ;;  %s769_s12 = smov 0  }
  0x2b   :  { %s771_s13 = smov 0  }
  0x2c LB: > { %1057 = sst [smem:[#allocation25_spill]] %s693_s10  ;;  %s399_s14 = sadd.s32 4294967295, %s705_s13   ;;  %s705_s13 = sphi %s771_s13, %s35_s13   ;;  %s701_s12 = sphi %s769_s12, %s1092_s12   ;;  %s697_s11 = sphi %s767_s11, %s1091_s11   ;;  %s693_s10 = sphi %s765_s10, %s1084_s10   ;;  %s689_s9 = sphi %s763_s9, %s1090_s9   ;;  %s685_s8 = sphi %s761_s8, %s1089_s8   ;;  %s681_s7 = sphi %s759_s7, %s1088_s7   ;;  %s677_s2 = sphi %s757_s2, %s1087_s2   ;;  %s673_s6 = sphi %s755_s6, %s1086_s6  }
  0x2d   : > { %s47_s15 = sadd.s32 1, %s701_s12  ;;  %s51_s16 = sld [smem:[#allocation4 + %s701_s12]] }
  0x2e   : > { %p49_p1 = scmp.ge.s32.totalorder %s47_s15, 2  ;;  %s52_s17 = sld [smem:[#allocation3 + %s701_s12]] }
  0x2f   : > { %s66_s18 = sadd.s32 1, %s693_s10  ;;  %s53_s19 = sld [smem:[#allocation5 + %s701_s12]] }
  0x30   : > { %s1094_s15 = smov (%p49_p1, %s47_s15), 0  ;;  %p73_p2 = scmp.ne.s32.totalorder %s693_s10, %s689_s9 }
  0x31   : > { %1058 = sst [smem:[#allocation26_spill]] %s1094_s15  ;;  %p1047_p3 = scmp.eq.s32.totalorder %s705_s13, 0 }
  0x32   : > { %s55_s20 = sld [smem:[#allocation4 + %s1094_s15]]  ;;  %p79_p4 = scmp.ne.s32.totalorder %s689_s9, %s685_s8 }
  0x33   : > { %s56_s21 = sld [smem:[#allocation3 + %s1094_s15]]  ;;  %p815_p5 = por %p1047_p3, %p73_p2 }
  0x34   : > { %s57_s22 = sld [smem:[#allocation5 + %s1094_s15]]  ;;  %p819_p6 = scmp.eq.s32.totalorder %s399_s14, 0 }
  0x35   : > { %p1046_p7 = scmp.lt.s32.totalorder %s705_s13, 2  ;;  %s1045_s25 = sand.u32 1, %s693_s10  }
  0x36   : > { %s1060_s24 = scalar_select %p819_p6, 1, 0 }
  0x37   : > { %p827_p8 = por %p819_p6, %p79_p4  ;;  %s403_s1 = sshll.u32 %s1045_s25, 2 }
  0x38   : > { %s59_s0 = ssub.s32 %s51_s16, %s55_s20  ;;  %s171_s8 = scalar_lea.vmem [#allocation6], %s403_s1 }
  0x39   : > { %s1061_s26 = scalar_select %p827_p8, 1, 0 }
  0x3a   : > { %s60_s27 = ssub.s32 %s52_s17, %s56_s21  ;;  %s62_s29 = ssub.s32 %s53_s19, %s57_s22 }
  0x3b   : > { %s61_s28 = sor.u32 %s60_s27, %s59_s0  ;;  %s185_s14 = sshll.u32 %s171_s8, 4  ;;  %s833_s14 = int_to_ptr.vmem [resolvable:$true] %s185_s14 }
  0x3c   : > { %s63_s30 = sor.u32 %s62_s29, %s61_s28  ;;  %p853_p10 = pnand %p1046_p7, %p815_p5 }
  0x3d   : > { %p64_p9 = scmp.eq.s32.totalorder %s63_s30, 0  ;;  %p411_p11 = scmp.ge.s32.totalorder %s705_s13, 1 }
  0x3e   : > { %s418_s16 = scalar_select %p815_p5, [#allocation4], [#allocation10] }
  0x3f   : > { %s838_s20 = scalar_select %p64_p9, %s693_s10, %s66_s18  }
  0x40   : > { %s419_s25 = scalar_select %p815_p5, %s701_s12, 0 }
  0x41   : > { %1062 = sst [smem:[#allocation27_spill]] %s838_s20  ;;  %s1096_s16 = smov (!%p1046_p7, %s418_s16), [#allocation16] }
  0x42   : > { %s1098_s25 = smov (!%p1046_p7, %s419_s25), 0  ;;  %p221_p12 = scmp.lt.s32.totalorder %s705_s13, 3 }
  0x43   : > { %s420_s17 = scalar_select %p815_p5, [#allocation3], [#allocation11] }
  0x44   : > { %s172_s19 = sld [smem:[%s1096_s16 + %s1098_s25]]  ;;  %p865_p13 = pnand %p411_p11, %p221_p12 }
  0x45   : > { %s1100_s17 = smov (!%p1046_p7, %s420_s17), [#allocation17]  ;;  %s870_s29 = sld [smem:[#allocation4 + %s701_s12]] }
  0x46   : > { %s422_s18 = scalar_select %p815_p5, [#allocation5], [#allocation12] }
  0x47   : > { %s173_s22 = sld [smem:[%s1100_s17 + %s1098_s25]]  ;;  %p571_p1 = pneg %p853_p10 }
  0x48   : > { %s1102_s18 = smov (!%p1046_p7, %s422_s18), [#allocation18]  ;;  %s873_s23 = sld [smem:[#allocation3 + %s701_s12]] }
  0x49   : > { %s174_s0 = sld [smem:[%s1102_s18 + %s1098_s25]]  ;;  %s1066_s18 = sand.u32 1, %s693_s10  }
  0x4a   : > { %s416_s1 = sshll.u32 %s172_s19, 3  ;;  %s876_s16 = sld [smem:[#allocation5 + %s701_s12]] }
  0x4b   : > { %s1064_s27 = scalar_select %p865_p13, 1, 0 }
  0x4c   : > { %s1065_s3 = sld [smem:[#allocation28_spill]] }
  0x4d   : > { %s884_s19 = sld [smem:[#allocation4 + %s1094_s15]] }
  0x4f   : > { %s180_s28 = sadd.s32 %s174_s0, %s173_s22  ;;  %s888_s22 = scalar_lea.sflag [#allocation7], %s1066_s18 }
  0x50   : > { %s182_s30 = sadd.s32 %s416_s1, %s180_s28 }
  0x51   : > { %s406_s8 = sshll.u32 %s182_s30, 5 }
  0x52   : > { %s881_s25 = scalar_lea.hbm %s1065_s3, %s406_s8  ;;  %s574_s20 = scalar_lea.hbm %s1065_s3, 256 }
  0x53   : > { %s569_s0 = scalar_lea.hbm %s881_s25, 64  ;;  %p575_p5 = scmp.lt.s32.totalorder %s881_s25, %s1065_s3 }
  0x54   : > { %p570_p0 = scmp.ne.s32.totalorder %s881_s25, %s569_s0  ;;  %p576_p9 = scmp.lt.s32.totalorder %s574_s20, %s569_s0 }
  0x56   : > { %p572_p2 = pnand %p571_p1, %p570_p0  ;;  %p577_p11 = por %p576_p9, %p575_p5 }
  0x58   : > { %p573_p4 = pneg %p572_p2 }
  0x5a   : > { %p578_p12 = pnand %p577_p11, %p573_p4 }
  0x5c   : > { %581 = shalt.err (!%p578_p12)
}
  0x5d   : > { %s582_s17 = scalar_lea.vmem %s833_s14, 64  ;;  %s710_s18 = smov [#allocation6]  }
  0x5e   : > { %p583_p7 = scmp.ne.s32.totalorder %s833_s14, %s582_s17  ;;  %s587_s10 = sshll.u32 %s710_s18, 4  ;;  %s588_s10 = int_to_ptr.vmem [resolvable:$false] %s587_s10 }
  0x5f   : > { %s589_s1 = scalar_lea.vmem %s588_s10, 128  ;;  %p590_p2 = scmp.lt.s32.totalorder %s833_s14, %s588_s10 }
  0x60   : > { %p585_p3 = pnand %p583_p7, %p571_p1  ;;  %p591_p8 = scmp.lt.s32.totalorder %s589_s1, %s582_s17 }
  0x62   : > { %p586_p0 = pneg %p585_p3  ;;  %p592_p13 = por %p591_p8, %p590_p2 }
  0x64   : > { %p593_p6 = pnand %p592_p13, %p586_p0 }
  0x66   : > { %596 = shalt.err (!%p593_p6)
}
  0x67   : > { %s1051_s0 = smov 128   ;;  %s1052_s10 = smov 32  }
  0x68   : > { %s1053_s28 = smov 2   ;;  %s94_s20 = sld [smem:[#allocation3 + %s1094_s15]] }
  0x69   : > { %443 = dma.hbm_to_vmem [thread:$0]  (!%p853_p10), %s881_s25, 64, %s833_s14, %s888_s22, %s1051_s0, %s1052_s10, %s1053_s28  }
  0x6a   : > { %s95_s30 = sld [smem:[#allocation5 + %s1094_s15]]  ;;  %p111_p3 = scmp.ne.s32.totalorder %s681_s7, %s677_s2 }
  0x6b   : > { %p117_p6 = scmp.ne.s32.totalorder %s677_s2, %s673_s6  ;;  %s97_s8 = ssub.s32 %s870_s29, %s884_s19 }
  0x6c   : > { %p1067_p7 = scmp.ne.s32.totalorder %s1060_s24, 0  ;;  %s104_s21 = sadd.s32 1, %s681_s7 }
  0x6d   : > { %p1069_p13 = scmp.eq.s32.totalorder %s705_s13, 0  ;;  %s195_s25 = sand.u32 1, %s681_s7  }
  0x6e   : > { %p922_p8 = por %p117_p6, %p1067_p7  ;;  %s98_s18 = ssub.s32 %s873_s23, %s94_s20 }
  0x6f   : > { %p930_p1 = por %p111_p3, %p1069_p13  ;;  %s99_s6 = sor.u32 %s98_s18, %s97_s8 }
  0x70   : > { %s1068_s17 = scalar_select %p922_p8, 1, 0 }
  0x71   : > { %s100_s29 = ssub.s32 %s876_s16, %s95_s30  ;;  %p1071_p4 = scmp.lt.s32.totalorder %s705_s13, 2 }
  0x72   : > { %s101_s24 = sor.u32 %s100_s29, %s99_s6  ;;  %s407_s8 = sshll.u32 %s195_s25, 2 }
  0x73   : > { %p102_p10 = scmp.eq.s32.totalorder %s101_s24, 0  ;;  %p940_p5 = pnand %p1071_p4, %p930_p1 }
  0x74   : > { %s425_s19 = scalar_select %p930_p1, [#allocation4], [#allocation13] }
  0x75   : > { %s947_s22 = scalar_select %p102_p10, %s681_s7, %s104_s21  }
  0x76   : > { %s426_s1 = scalar_select %p930_p1, %s701_s12, 0 }
  0x77   : > { %p1073_p9 = pmov %p1071_p4  ;;  %p1074_p11 = pmov %p1071_p4 }
  0x78   : > { %s427_s16 = scalar_select %p930_p1, [#allocation3], [#allocation14] }
  0x79   : > { %s1104_s19 = smov (!%p1073_p9, %s425_s19), [#allocation19]  ;;  %s1106_s1 = smov (!%p1074_p11, %s426_s1), 0 }
  0x7a   : > { %s200_s20 = sld [smem:[%s1104_s19 + %s1106_s1]]  ;;  %p1075_p12 = pmov %p1071_p4 }
  0x7b   : > { %s429_s30 = scalar_select %p930_p1, [#allocation5], [#allocation15] }
  0x7c   : > { %s1108_s16 = smov (!%p1075_p12, %s427_s16), [#allocation20]  ;;  %p1076_p0 = pmov %p1071_p4 }
  0x7d   : > { %s201_s18 = sld [smem:[%s1108_s16 + %s1106_s1]]  ;;  %s199_s29 = scalar_lea.vmem [#allocation8], %s407_s8 }
  0x7e   : > { %s1110_s30 = smov (!%p1076_p0, %s429_s30), [#allocation21]  ;;  %s213_s24 = sshll.u32 %s199_s29, 4  ;;  %s964_s24 = int_to_ptr.vmem [resolvable:$true] %s213_s24 }
  0x7f   : > { %s202_s21 = sld [smem:[%s1110_s30 + %s1106_s1]]  ;;  %s971_s14 = scalar_lea.sflag [#allocation9], %s195_s25 }
  0x80   : > { %s417_s6 = sshll.u32 %s200_s20, 3  ;;  %p599_p3 = pneg %p940_p5 }
  0x85   : > { %s208_s0 = sadd.s32 %s202_s21, %s201_s18 }
  0x86   : > { %s210_s10 = sadd.s32 %s417_s6, %s208_s0 }
  0x87   : > { %s410_s28 = sshll.u32 %s210_s10, 5  ;;  %s602_s10 = scalar_lea.hbm %s1041_s4, 256 }
  0x88   : > { %s969_s15 = scalar_lea.hbm %s1041_s4, %s410_s28 }
  0x89   : > { %s597_s16 = scalar_lea.hbm %s969_s15, 64  ;;  %p603_p13 = scmp.lt.s32.totalorder %s969_s15, %s1041_s4 }
  0x8a   : > { %p598_p2 = scmp.ne.s32.totalorder %s969_s15, %s597_s16  ;;  %p604_p1 = scmp.lt.s32.totalorder %s602_s10, %s597_s16 }
  0x8c   : > { %p600_p6 = pnand %p599_p3, %p598_p2  ;;  %p605_p10 = por %p604_p1, %p603_p13 }
  0x8e   : > { %p601_p7 = pneg %p600_p6 }
  0x90   : > { %p606_p4 = pnand %p605_p10, %p601_p7 }
  0x92   : > { %609 = shalt.err (!%p606_p4)
}
  0x93   : > { %s610_s3 = scalar_lea.vmem %s964_s24, 64  ;;  %s714_s28 = smov [#allocation8]  }
  0x94   : > { %p611_p9 = scmp.ne.s32.totalorder %s964_s24, %s610_s3  ;;  %s615_s25 = sshll.u32 %s714_s28, 4  ;;  %s616_s25 = int_to_ptr.vmem [resolvable:$false] %s615_s25 }
  0x95   : > { %s617_s8 = scalar_lea.vmem %s616_s25, 128  ;;  %p618_p0 = scmp.lt.s32.totalorder %s964_s24, %s616_s25 }
  0x96   : > { %p613_p11 = pnand %p611_p9, %p599_p3  ;;  %p619_p2 = scmp.lt.s32.totalorder %s617_s8, %s610_s3 }
  0x98   : > { %p614_p12 = pneg %p613_p11  ;;  %p620_p6 = por %p619_p2, %p618_p0 }
  0x9a   : > { %p621_p8 = pnand %p620_p6, %p614_p12 }
  0x9c   : > { %624 = shalt.err (!%p621_p8)
}
  0x9d   : > { %s1077_s18 = smov 2   ;;  %s1078_s21 = smov 32  }
  0x9e   : > { %s1079_s6 = smov 128   ;;  %p1080_p3 = scmp.ne.s32.totalorder %s1064_s27, 0 }
  0x9f   : > { %452 = dma.hbm_to_vmem [thread:$0]  (!%p940_p5), %s969_s15, 64, %s964_s24, %s971_s14, %s1079_s6, %s1078_s21, %s1077_s18  }
  0xa0   : > { %225 = sbr.rel (%p1080_p3) target bundleno = 192 (0xc0), region = 28  ;;  %s227_s29 = sand.u32 (!%p1080_p3), 1, %s689_s9  }
  0xa1   : > { %s412_s19 = sshll.u32 (!%p1080_p3), %s227_s29, 2  ;;  %s228_s16 = scalar_lea.sflag (!%p1080_p3), [#allocation7], %s227_s29 }
  0xa2   : > { %s231_s0 = scalar_lea.vmem (!%p1080_p3), [#allocation6], %s412_s19  ;;  %p1081_p7 = scmp.ne.s32.totalorder (!%p1080_p3), %s1061_s26, 0 }
  0xa5   : > { %664 = dma.done.wait (%p1081_p7), %s228_s16, 64  }
  0xa6   : > { %666 = vsyncadd (%p1081_p7), %s228_s16, 4294967232  ;;  %s236_s23 = sand.u32 1, %s677_s2   ;;  %p1082_p8 = scmp.ne.s32.totalorder %s1068_s17, 0 }
  0xa7   : > { %s413_s1 = sshll.u32 %s236_s23, 2  ;;  %s237_s10 = scalar_lea.sflag [#allocation9], %s236_s23 }
  0xa8   : > { %s240_s15 = scalar_lea.vmem [#allocation8], %s413_s1 }
  0xa9   : > { %668 = dma.done.wait (%p1082_p8), %s237_s10, 64  }
  0xaa   : > { %670 = vsyncadd (%p1082_p8), %s237_s10, 4294967232  ;;  %p274_p5 = scmp.lt.s32.totalorder %s697_s11, 1  ;;  %v715_v0 = vmov 0.0   ;;  %vm288_vm0 = vcmask 1041408   ;;  %v282_v1 = vld [vmem:[%s231_s0] sm:$0x3] }
  0xab   : > { %v283_v2 = vld [vmem:[%s231_s0 + $0x2] sm:$0x3]  ;;  %v284_v3 = vld [vmem:[%s240_s15] sm:$0x3]  ;;  %v285_v4 = vld [vmem:[%s240_s15 + $0x2] sm:$0x3] }
  0xac   : > { %s1112_s11 = smov (!%p274_p5, %s697_s11), 1  ;;  %v286_v5 = vmul.f32 %v284_v3, %v282_v1  ;;  %v287_v6 = vmul.f32 %v285_v4, %v283_v2 }
  0xad   : > { %s276_s26 = scalar_lea.vmem %s1042_s5, %s1112_s11 }
  0xae   : > { %281 = vst [vmem:[%s276_s26] sm:$0x1] %v715_v0  ;;  %v289_v7 = vsel %vm288_vm0, %v286_v5, 0.0  ;;  %v290_v8 = vsel %vm288_vm0, %v287_v6, 0.0 }
  0xaf   : > { %v291_v9 = vadd.f32 %v290_v8, %v289_v7 }
  0xb1   : > { %v292_v10 = vrot.slane %v291_v9, 4 }
  0xb3   : > { %v293_v11 = vadd.f32 %v292_v10, %v291_v9 }
  0xb5   : > { %v294_v12 = vrot.slane %v293_v11, 2  ;;  %v298_v15 = vld [vmem:[%s276_s26] sm:$0x1] }
  0xb7   : > { %v295_v13 = vadd.f32 %v294_v12, %v293_v11 }
  0xb9   : > { %v296_v14 = vrot.slane %v295_v13, 1 }
  0xbb   : > { %v297_v16 = vadd.f32 %v296_v14, %v295_v13 }
  0xbd   : > { %v299_v17 = vadd.f32 %v298_v15, %v297_v16 }
  0xbf   : > { %300 = vst [vmem:[%s276_s26] sm:$0x1] %v299_v17 }
  0xc0 PF: > { %s35_s13 = sadd.s32 1, %s705_s13   ;;  %s1083_s11 = sld [smem:[#allocation25_spill]] }
  0xc1   : > { %p32_p13 = scmp.ge.s32.totalorder %s35_s13, 4   ;;  %s1084_s10 = sld [smem:[#allocation27_spill]] }
  0xc2   : > { %s1085_s17 = sld [smem:[#allocation26_spill]]  ;;  %s1086_s6 = smov %s677_s2 }
  0xc3   : > { %s1087_s2 = smov %s681_s7  ;;  %s1088_s7 = smov %s947_s22 }
  0xc4   : > { %s1089_s8 = smov %s689_s9  ;;  %34 = sbr.rel (!%p32_p13) target bundleno = 44 (0x2c), region = 85 }
  0xc6   : > { %s1090_s9 = smov %s1083_s11  ;;  %s1091_s11 = smov %s701_s12 }
  0xc8   : > { %s1092_s12 = smov %s1085_s17 }
  0xc9   :  { %318 = vsyncpa [#allocation7], 1 }
  0xca   :  { %320 = vsyncpa [#allocation7 + $0x1], 1 }
  0xcb   :  { %321 = vsyncpa [#allocation9], 1 }
  0xcc   :  { %323 = vsyncpa [#allocation9 + $0x1], 1 }

</bundles_post_ra>
